<compile_context>
chip_gen: v6e
topology: v6e:2x2x1
jax: 0.10.0
libtpu: 0.0.40
codegen_flags: <defaults>
</compile_context>

<pallas_src>
import jax
import jax.numpy as jnp
from jax.experimental import pallas as pl
from jax.experimental.pallas import tpu as pltpu


def _mobius_kernel(w_ref, x_ref, o_ref):
    # w_ref: (C,) float32 resident in SMEM; channel index = grid axis 1.
    c = pl.program_id(1)
    w = w_ref[c]                                # scalar load from SMEM
    x = x_ref[...].astype(jnp.float32)          # no-op for f32 inputs
    diff = x - w
    # NOTE: matches PyTorch exactly — inf/NaN when x == w (division by zero).
    scale = (1.0 - w * w) / jnp.abs(diff)
    o_ref[...] = (scale * diff - w).astype(o_ref.dtype)


def _pick_row_block(rows: int, max_rows: int) -> int:
    """Largest row-block <= max_rows that is a multiple of 8 and divides `rows`
    (or the full extent if `rows` already fits / has no nice divisor)."""
    if rows <= max_rows:
        return rows
    cap = max_rows - (max_rows % 8)
    for cand in range(cap, 7, -8):
        if rows % cand == 0:
            return cand
    return rows


def mobius_flow(x: jax.Array, w: jax.Array, *, lane: int = 128,
                max_block_rows: int = 2048) -> jax.Array:
    """MobiusFlow forward transform.

    x: (B, C, H, W)   (NCHW, same as the PyTorch module)
    w: (1, C, 1, 1)   per-channel Mobius parameter
    """
    B, C, H, Wd = x.shape
    hw = H * Wd

    # Lane-dense view of each channel's spatial slab. reshape of a contiguous
    # array is free; pad only if H*W is not lane-aligned (pad lanes discarded).
    pad = (-hw) % lane
    x3 = x.reshape(B, C, hw)
    if pad:
        x3 = jnp.pad(x3, ((0, 0), (0, 0), (0, pad)), constant_values=1.0)
    hw_p = hw + pad
    rows = hw_p // lane
    rb = _pick_row_block(rows, max_block_rows)
    x4 = x3.reshape(B, C, rows, lane)

    # Tiny (C,) parameter table -> SMEM (no full-size broadcast stream).
    w_c = w.reshape(C).astype(jnp.float32)

    grid = (B, C, rows // rb)
    out = pl.pallas_call(
        _mobius_kernel,
        out_shape=jax.ShapeDtypeStruct((B, C, rows, lane), x.dtype),
        grid=grid,
        in_specs=[
            pl.BlockSpec(memory_space=pltpu.MemorySpace.SMEM),      # w table
            pl.BlockSpec((1, 1, rb, lane), lambda b, c, r: (b, c, r, 0)),
        ],
        out_specs=pl.BlockSpec((1, 1, rb, lane), lambda b, c, r: (b, c, r, 0)),
        compiler_params=pltpu.CompilerParams(
            dimension_semantics=("parallel", "parallel", "parallel"),
        ),
    )(w_c, x4)

    out = out.reshape(B, C, hw_p)
    if pad:
        out = out[..., :hw]
    return out.reshape(B, C, H, Wd)


def mobius_flow_ref(x, w):
    diff = x - w
    return (1.0 - jnp.abs(w) ** 2) / jnp.abs(diff) * diff - w


if __name__ == "__main__":
    key = jax.random.PRNGKey(0)
    kx, kw = jax.random.split(key)

    B, C, H, W = 2, 4, 16, 16
    x = jax.random.normal(kx, (B, C, H, W), dtype=jnp.float32)
    # Mobius parameter with |w| < 1 (typical for this transform).
    c_init_value = 0.3 * jax.random.normal(kw, (1, C, 1, 1), dtype=jnp.float32)

    out = jax.block_until_ready(mobius_flow(x, c_init_value))

    ref = mobius_flow_ref(x, c_init_value)
    assert out.shape == x.shape
    assert jnp.allclose(out, ref, rtol=1e-5, atol=1e-5), "mismatch vs reference"

    print("KERNEL_OK")
</pallas_src>

<mosaic_0001>
module attributes {stable_mosaic.version = 11 : i64} {
  func.func @_mobius_kernel(%arg0: i32, %arg1: i32, %arg2: i32, %arg3: memref<4xf32, #tpu.memory_space<smem>>, %arg4: memref<1x1x2x128xf32, #tpu.memory_space<vmem>>, %arg5: memref<1x1x2x128xf32, #tpu.memory_space<vmem>>) attributes {dimension_semantics = [#tpu.dimension_semantics<parallel>, #tpu.dimension_semantics<parallel>, #tpu.dimension_semantics<parallel>], iteration_bounds = array<i64: 2, 4, 1>, scalar_prefetch = 0 : i64, scratch_operands = 0 : i64, tpu.core_type = #tpu.core_type<tc>, window_params = [{transform_indices = @transform_0, window_bounds = array<i64: 4>}, {transform_indices = @transform_1, window_bounds = array<i64: 1, 1, 2, 128>}, {transform_indices = @transform_2, window_bounds = array<i64: 1, 1, 2, 128>}]} {
    %0 = arith.index_cast %arg1 : i32 to index
    %1 = memref.load %arg3[%0] : memref<4xf32, #tpu.memory_space<smem>>
    %c0 = arith.constant 0 : index
    %c0_0 = arith.constant 0 : index
    %c0_1 = arith.constant 0 : index
    %c0_2 = arith.constant 0 : index
    %2 = vector.load %arg4[%c0, %c0_0, %c0_1, %c0_2] : memref<1x1x2x128xf32, #tpu.memory_space<vmem>>, vector<1x1x2x128xf32>
    %3 = vector.broadcast %1 : f32 to vector<1x1x2x128xf32>
    %4 = arith.subf %2, %3 : vector<1x1x2x128xf32>
    %5 = arith.mulf %1, %1 : f32
    %cst = arith.constant 1.000000e+00 : f32
    %6 = arith.subf %cst, %5 : f32
    %7 = math.absf %4 : vector<1x1x2x128xf32>
    %8 = vector.broadcast %6 : f32 to vector<1x1x2x128xf32>
    %9 = arith.divf %8, %7 : vector<1x1x2x128xf32>
    %10 = arith.mulf %9, %4 : vector<1x1x2x128xf32>
    %11 = vector.broadcast %1 : f32 to vector<1x1x2x128xf32>
    %12 = arith.subf %10, %11 : vector<1x1x2x128xf32>
    %c0_3 = arith.constant 0 : index
    %c0_4 = arith.constant 0 : index
    %c0_5 = arith.constant 0 : index
    %c0_6 = arith.constant 0 : index
    %13 = vector.load %arg5[%c0_3, %c0_4, %c0_5, %c0_6] : memref<1x1x2x128xf32, #tpu.memory_space<vmem>>, vector<1x1x2x128xf32>
    tpu.vector_store %arg5[%c0_3, %c0_4, %c0_5, %c0_6], %12 {strides = array<i32>} : memref<1x1x2x128xf32, #tpu.memory_space<vmem>>, vector<1x1x2x128xf32>,
    return
  }
  func.func @transform_0(%arg0: i32, %arg1: i32, %arg2: i32) -> i32 {
    %c0_i32 = arith.constant 0 : i32
    %c0_i32_0 = arith.constant 0 : i32
    return %c0_i32 : i32
  }
  func.func @transform_1(%arg0: i32, %arg1: i32, %arg2: i32) -> (i32, i32, i32, i32) {
    %c0_i32 = arith.constant 0 : i32
    %c0_i32_0 = arith.constant 0 : i32
    return %arg0, %arg1, %arg2, %c0_i32 : i32, i32, i32, i32
  }
  func.func @transform_2(%arg0: i32, %arg1: i32, %arg2: i32) -> (i32, i32, i32, i32) {
    %c0_i32 = arith.constant 0 : i32
    %c0_i32_0 = arith.constant 0 : i32
    return %arg0, %arg1, %arg2, %c0_i32 : i32, i32, i32, i32
  }
}

</mosaic_0001>

<bundles_post_ra>
// kernel: tpu_custom_call.1
= control target key start
LH: loop header
LB: loop body
LE: loop exit
PB: predicated region body
PF: predicated region fallthrough
CT: control target
= control target key end

     0   :  { %s784_s0 = inlined_call_operand.hbm [shape: f32[4], index: 0, kind: input, shape index: {}]   ;;  %s785_s1 = inlined_call_operand.hbm [shape: f32[2,4,2,128], index: 1, kind: input, shape index: {}]   ;;  %s786_s2 = inlined_call_operand.hbm [shape: f32[2,4,2,128], index: 2, kind: output, shape index: {}]  }
   0x1   :  { %791 = sst [smem:[#allocation14_spill]] %s784_s0 }
   0x2   :  { %7 = vsyncpa [#allocation5], 0 }
   0x3   :  { %8 = vsyncpa [#allocation3], 0 }
   0x4   :  { %10 = vsyncpa [#allocation3 + $0x1], 0 }
   0x5   :  { %11 = vsyncpa [#allocation4], 0 }
   0x6   :  { %13 = vsyncpa [#allocation4 + $0x1], 0  ;;  %s600_s9 = smov 0   ;;  %s602_s10 = smov 0  }
   0x7   :  { %s604_s11 = smov 0   ;;  %s606_s12 = smov 0  }
   0x8   :  { %s608_s13 = smov 0   ;;  %s610_s14 = smov 0  }
   0x9   :  { %s612_s15 = smov 0   ;;  %s614_s16 = smov 0  }
   0xa LB: > { %s333_s17 = sadd.s32 4294967295, %s580_s16   ;;  %s334_s18 = sadd.s32 4294967294, %s580_s16   ;;  %s580_s16 = sphi %s614_s16, %s19_s16   ;;  %s576_s15 = sphi %s612_s15, %s815_s15   ;;  %s572_s14 = sphi %s610_s14, %s814_s14   ;;  %s568_s13 = sphi %s608_s13, %s813_s13   ;;  %s564_s12 = sphi %s606_s12, %s812_s12   ;;  %s560_s11 = sphi %s604_s11, %s811_s11   ;;  %s556_s10 = sphi %s602_s10, %s810_s10   ;;  %s552_s9 = sphi %s600_s9, %s809_s9  }
   0xb   : > { %p83_p0 = scmp.ne.s32.totalorder %s556_s10, %s552_s9  ;;  %p644_p1 = scmp.eq.s32.totalorder %s333_s17, 0 }
   0xc   : > { %p648_p2 = scmp.eq.s32.totalorder %s333_s17, 7  ;;  %p117_p3 = scmp.eq.s32.totalorder %s334_s18, 7 }
   0xd   : > { %p654_p4 = por %p644_p1, %p83_p0  ;;  %p335_p5 = scmp.ge.s32.totalorder %s580_s16, 1 }
   0xe   : > { %p659_p6 = por %p117_p3, %p83_p0  ;;  %p124_p7 = scmp.lt.s32.totalorder %s580_s16, 9 }
   0xf   : > { %s34_s24 = sadd.s32 1, %s572_s14  ;;  %s38_s25 = sadd.s32 1, %s576_s15 }
  0x10   : > { %s795_s22 = scalar_select %p659_p6, 1, 0 }
  0x11   : > { %p664_p8 = pnand %p335_p5, %p124_p7  ;;  %p36_p11 = scmp.ge.s32.totalorder %s34_s24, 4 }
  0x12   : > { %796 = sst [smem:[#allocation11_spill]] %s795_s22  ;;  %s582_s26 = smov [#allocation2]  }
  0x13   : > { %p358_p9 = pneg %p664_p8  ;;  %s798_s0 = sld [smem:[#allocation14_spill]] }
  0x14   : > { %s817_s24 = smov (%p36_p11, %s34_s24), 0  ;;  %s819_s25 = smov (!%p36_p11, %s38_s25), %s576_s15 }
  0x15   : > { %p359_p10 = pnand %p358_p9, %p644_p1  ;;  %799 = sst [smem:[#allocation12_spill]] %s817_s24 }
  0x16   : > { %s64_s29 = ssub.s32 %s572_s14, %s817_s24  ;;  %s70_s30 = sadd.s32 1, %s560_s11 }
  0x17   : > { %p40_p12 = scmp.ge.s32.totalorder %s819_s25, 2  ;;  %p77_p13 = scmp.ne.s32.totalorder %s560_s11, %s556_s10 }
  0x18   : > { %p78_p0 = scmp.eq.s32.totalorder %s580_s16, 0  ;;  %p371_p3 = scmp.lt.s32.totalorder %s580_s16, 8 }
  0x19   : > { %361 = dma.hbm_to_smem (!%p359_p10), %s798_s0, 16, %s582_s26, [#allocation5]  }
  0x1a   : > { %s821_s25 = smov (%p40_p12, %s819_s25), 0  ;;  %p689_p5 = por %p78_p0, %p77_p13 }
  0x1b   : > { %800 = sst [smem:[#allocation13_spill]] %s821_s25  ;;  %p695_p7 = por %p648_p2, %p77_p13 }
  0x1c   : > { %s63_s5 = ssub.s32 %s576_s15, %s821_s25  ;;  %s146_s6 = sand.u32 1, %s560_s11  }
  0x1d   : > { %s802_s4 = scalar_select %p695_p7, 1, 0 }
  0x1e   : > { %s65_s7 = sor.u32 %s64_s29, %s63_s5  ;;  %s338_s8 = sshll.u32 %s146_s6, 1 }
  0x1f   : > { %p68_p9 = scmp.eq.s32.totalorder %s65_s7, 0  ;;  %s339_s17 = sshll.u32 %s576_s15, 2 }
  0x20   : > { %s156_s26 = sadd.s32 %s572_s14, %s339_s17  ;;  %s150_s27 = scalar_lea.vmem [#allocation6], %s338_s8 }
  0x21   : > { %s704_s18 = scalar_select %p68_p9, %s560_s11, %s70_s30  }
  0x22   : > { %s160_s28 = sshll.u32 %s150_s27, 4  ;;  %s340_s0 = sshll.u32 %s156_s26, 5  ;;  %s161_s28 = int_to_ptr.vmem [resolvable:$true] %s160_s28 }
  0x23   : > { %s158_s22 = scalar_lea.hbm %s785_s1, %s340_s0  ;;  %p714_p2 = pnand %p371_p3, %p689_p5 }
  0x24   : > { %s147_s29 = scalar_lea.sflag [#allocation3], %s146_s6  ;;  %s465_s30 = scalar_lea.vmem %s161_s28, 32 }
  0x25   : > { %p454_p10 = pneg %p714_p2  ;;  %p466_p11 = scmp.ne.s32.totalorder %s161_s28, %s465_s30 }
  0x26   : > { %s583_s5 = smov [#allocation6]  }
  0x27   : > { %p468_p12 = pnand %p466_p11, %p454_p10  ;;  %s470_s7 = sshll.u32 %s583_s5, 4  ;;  %s471_s7 = int_to_ptr.vmem [resolvable:$false] %s470_s7 }
  0x28   : > { %s472_s8 = scalar_lea.vmem %s471_s7, 64  ;;  %p473_p0 = scmp.lt.s32.totalorder %s161_s28, %s471_s7 }
  0x29   : > { %p469_p13 = pneg %p468_p12  ;;  %p474_p9 = scmp.lt.s32.totalorder %s472_s8, %s465_s30 }
  0x2b   : > { %p475_p6 = por %p474_p9, %p473_p0 }
  0x2d   : > { %p476_p7 = pnand %p475_p6, %p469_p13 }
  0x2f   : > { %479 = shalt.err (!%p476_p7)
}
  0x30   : > { %365 = dma.hbm_to_vmem [thread:$0]  (!%p714_p2), %s158_s22, 32, %s161_s28, %s147_s29  }
  0x31   : > { %169 = sbr.rel (%p664_p8) target bundleno = 105 (0x69), region = 28 }
  0x36   : > { %539 = dma.done.wait (%p644_p1), [#allocation5], 16  }
  0x37   : > { %541 = vsyncadd (%p644_p1), [#allocation5], 4294967280  ;;  %s729_s0 = sand.u32 1, %s556_s10  }
  0x38   : > { %s343_s24 = sshll.u32 %s729_s0, 1  ;;  %s176_s3 = scalar_lea.sflag [#allocation3], %s729_s0 }
  0x39   : > { %s179_s6 = scalar_lea.vmem [#allocation6], %s343_s24 }
  0x3a   : > { %543 = dma.done.wait (%p654_p4), %s176_s3, 32  }
  0x3b   : > { %545 = vsyncadd (%p654_p4), %s176_s3, 4294967264 }
  0x3c   : > { %184 = sfence }
  0x3d   : > { %s201_s19 = sld [smem:[#allocation2 + %s564_s12]]  ;;  %v202_v0 = vld [vmem:[%s179_s6] sm:$0x3]  ;;  %s346_s25 = sshll.u32 %s568_s13, 2 }
  0x3e   : > { %s227_s17 = sadd.s32 %s564_s12, %s346_s25  ;;  %s200_s21 = scalar_lea.vmem [#allocation7], %s343_s24 }
  0x3f   : > { %s231_s26 = sshll.u32 %s200_s21, 4  ;;  %s347_s27 = sshll.u32 %s227_s17, 5  ;;  %s232_s26 = int_to_ptr.vmem [resolvable:$true] %s231_s26 }
  0x40   : > { %s229_s29 = scalar_lea.hbm %s786_s2, %s347_s27  ;;  %s215_s30 = scalar_lea.sflag [#allocation4], %s729_s0 }
  0x41   : > { %s480_s5 = scalar_lea.vmem %s232_s26, 32  ;;  %p804_p4 = scmp.ne.s32.totalorder %s802_s4, 0 }
  0x42   : > { %p481_p1 = scmp.ne.s32.totalorder %s232_s26, %s480_s5  ;;  %s584_s12 = smov [#allocation7]  }
  0x43   : > { %v203_v1 = vstv %s201_s19  ;;  %s205_s22 = smul.f32 %s201_s19, %s201_s19  ;;  %s484_s13 = sshll.u32 %s584_s12, 4  ;;  %s485_s13 = int_to_ptr.vmem [resolvable:$false] %s484_s13 }
  0x44   : > { %v204_v2 = vsub.f32 %v202_v0, %v203_v1  ;;  %p482_p6 = pnand %p481_p1, %p804_p4  ;;  %s486_s7 = scalar_lea.vmem %s485_s13, 64 }
  0x45   : > { %s206_s23 = ssub.f32 1.0, %s205_s22  ;;  %p487_p3 = scmp.lt.s32.totalorder %s232_s26, %s485_s13 }
  0x46   : > { %v207_v3 = vand.u32 2147483647, %v204_v2  ;;  %p483_p8 = pneg %p482_p6  ;;  %p488_p5 = scmp.lt.s32.totalorder %s486_s7, %s480_s5 }
  0x47   : > { %v208_v4 = vstv %s206_s23 }
  0x48   : > { %439 = vrcp.f32 %v207_v3  ;;  %p489_p7 = por %p488_p5, %p487_p3 }
  0x4a   : > { %p490_p2 = pnand %p489_p7, %p483_p8 }
  0x55   : > { %v440_v5 = vpop.eup %439 }
  0x56   : > { %v210_v6 = vmul.f32 %v440_v5, %v208_v4 }
  0x58   : > { %v211_v7 = vmul.f32 %v210_v6, %v204_v2 }
  0x5a   : > { %v212_v8 = vsub.f32 %v211_v7, %v203_v1 }
  0x5c   : > { %213 = vst [vmem:[%s200_s21] sm:$0x3] %v212_v8 }
  0x5d   : > { %493 = shalt.err (!%p490_p2)
}
  0x5e   : > { %s494_s8 = scalar_lea.hbm %s229_s29, 32  ;;  %s498_s3 = scalar_lea.hbm %s786_s2, 256 }
  0x5f   : > { %p495_p10 = scmp.ne.s32.totalorder %s229_s29, %s494_s8  ;;  %p499_p13 = scmp.lt.s32.totalorder %s229_s29, %s786_s2 }
  0x60   : > { %p500_p0 = scmp.lt.s32.totalorder %s498_s3, %s494_s8 }
  0x61   : > { %p496_p11 = pnand %p495_p10, %p804_p4 }
  0x62   : > { %p501_p9 = por %p500_p0, %p499_p13 }
  0x63   : > { %p497_p12 = pneg %p496_p11 }
  0x65   : > { %p502_p1 = pnand %p501_p9, %p497_p12 }
  0x67   : > { %505 = shalt.err (!%p502_p1)
}
  0x68   : > { %356 = dma.vmem_to_hbm [thread:$0]  (%p804_p4), %s232_s26, 32, %s229_s29, %s215_s30  }
  0x69 PF: > { %s805_s22 = sld [smem:[#allocation11_spill]]  ;;  %p373_p6 = scmp.ge.s32.totalorder %s580_s16, 2 }
  0x6a   : > { %s243_s23 = sand.u32 1, %s552_s9  }
  0x6b   : > { %s244_s25 = scalar_lea.sflag [#allocation4], %s243_s23 }
  0x6f   : > { %p806_p8 = scmp.ne.s32.totalorder %s805_s22, 0 }
  0x71   : > { %p367_p3 = pnand %p373_p6, %p806_p8 }
  0x73   : > { %p368_p5 = pneg %p367_p3 }
  0x75   : > { %547 = dma.done.wait (%p368_p5), %s244_s25, 32  }
  0x76   : > { %549 = vsyncadd (%p368_p5), %s244_s25, 4294967264  ;;  %s19_s16 = sadd.s32 1, %s580_s16   ;;  %s807_s4 = sld [smem:[#allocation12_spill]] }
  0x77   : > { %p16_p7 = scmp.ge.s32.totalorder %s19_s16, 10   ;;  %s808_s17 = sld [smem:[#allocation13_spill]] }
  0x78   : > { %s809_s9 = smov %s556_s10  ;;  %s810_s10 = smov %s560_s11 }
  0x79   : > { %s811_s11 = smov %s704_s18  ;;  %s812_s12 = smov %s572_s14 }
  0x7a   : > { %s813_s13 = smov %s576_s15  ;;  %18 = sbr.rel (!%p16_p7) target bundleno = 10 (0xa), region = 78 }
  0x7c   : > { %s814_s14 = smov %s807_s4 }
  0x7d   : > { %s815_s15 = smov %s808_s17 }
  0x7f   :  { %249 = vsyncpa [#allocation3], 1 }
  0x80   :  { %251 = vsyncpa [#allocation3 + $0x1], 1 }
  0x81   :  { %252 = vsyncpa [#allocation4], 1 }
  0x82   :  { %254 = vsyncpa [#allocation4 + $0x1], 1 }
  0x83   :  { %255 = vsyncpa [#allocation5], 1 }
  0x84   :  { %257 = vsyncpa [#allocation5 + $0x1], 1 }

</bundles_post_ra>
